<compile_context>
chip_gen: v6e
topology: v6e:2x2x1
jax: 0.10.0
libtpu: 0.0.40
codegen_flags: <defaults>
</compile_context>

<pallas_src>
import functools

import jax
import jax.numpy as jnp
from jax.experimental import pallas as pl
from jax.experimental.pallas import tpu as pltpu


CFG = dict(
    vocab_size=100,
    hidden=32,
    num_layers=2,
    num_heads=4,
    intermediate=64,
    max_pos=16,
    type_vocab=2,
    num_labels=1,
)

LN_EPS = 1e-12


# ------------------------------ kernel helpers ------------------------------ #

def _layernorm(x, gamma, beta, eps):
    """f32 layernorm over the last axis. x: (M, H); gamma/beta: (1, H)."""
    x = x.astype(jnp.float32)
    mean = jnp.mean(x, axis=-1, keepdims=True)
    var = jnp.mean((x - mean) ** 2, axis=-1, keepdims=True)
    y = (x - mean) * jax.lax.rsqrt(var + eps)
    return y * gamma.astype(jnp.float32) + beta.astype(jnp.float32)


# ------------------------------- fused kernel ------------------------------- #

def _encoder_kernel(x_ref, mask_ref, embg_ref, embb_ref,
                    wqkv_ref, bqkv_ref, wo_ref, bo_ref,
                    ln1g_ref, ln1b_ref,
                    w1_ref, b1_ref, w2_ref, b2_ref,
                    ln2g_ref, ln2b_ref,
                    o_ref, *, num_heads, eps):
    """Grid = (batch, layer).  One step == one transformer layer for one batch
    element.  The residual stream lives in o_ref: its block index is constant
    over the layer axis, so the output block stays VMEM-resident across layers
    and is only written back to HBM when the batch index advances."""
    l = pl.program_id(1)

    # Fold the embedding layernorm into the first layer step.
    @pl.when(l == 0)
    def _():
        o_ref[0] = _layernorm(x_ref[0], embg_ref[...], embb_ref[...], eps)

    x = o_ref[0]                                   # (S, H) float32 residual
    S, H = x.shape
    dh = H // num_heads

    # ---- fused, head-major QKV projection (one batched MXU einsum) ----------
    # wqkv is (nH, H, 3*dh): the leading-batch matmul directly yields head-major
    # activations -- no per-head loop, no minor-dim reshapes, no transposes.
    # The 1/sqrt(dh) scale is already folded into the W_Q columns at init.
    x_b = jnp.broadcast_to(x.astype(jnp.bfloat16)[None], (num_heads, S, H))
    qkv = jnp.einsum('hse,hec->hsc', x_b, wqkv_ref[0],
                     preferred_element_type=jnp.float32)
    qkv = qkv + bqkv_ref[0].astype(jnp.float32)    # (nH, S, 3*dh)

    q = qkv[..., 0 * dh:1 * dh]                    # (nH, S, dh)
    k = qkv[..., 1 * dh:2 * dh]
    v = qkv[..., 2 * dh:3 * dh]

    # ---- batched whole-head self-attention ----------------------------------
    mask = mask_ref[...].astype(jnp.float32)       # (1, 1, S) additive key mask
    s = jnp.einsum('hqd,hkd->hqk',
                   q.astype(jnp.bfloat16), k.astype(jnp.bfloat16),
                   preferred_element_type=jnp.float32)        # (nH, S, S)
    s = s + mask                                   # broadcast over heads/queries
    m = jnp.max(s, axis=-1, keepdims=True)
    p = jnp.exp(s - m)
    p = p * pl.reciprocal(jnp.sum(p, axis=-1, keepdims=True), approx=True)
    ctx = jnp.einsum('hqk,hkd->hqd',
                     p.astype(jnp.bfloat16), v.astype(jnp.bfloat16),
                     preferred_element_type=jnp.float32)      # (nH, S, dh)

    # merge_heads + output projection: batched per-head (dh, H) matmul, then a
    # reduction over the leading head axis (no concat, no W_O row slices).
    attn = jnp.einsum('hqd,hde->hqe', ctx.astype(jnp.bfloat16), wo_ref[0],
                      preferred_element_type=jnp.float32)     # (nH, S, H)
    attn = jnp.sum(attn, axis=0) + bo_ref[0].astype(jnp.float32)

    # ---- residual + layernorm (fused epilogue) ----
    x = _layernorm(x + attn, ln1g_ref[0], ln1b_ref[0], eps)

    # ---- feed-forward: gelu(x @ W1 + b1) @ W2 + b2, residual + layernorm ----
    h1 = (jnp.dot(x.astype(jnp.bfloat16), w1_ref[0],
                  preferred_element_type=jnp.float32)
          + b1_ref[0].astype(jnp.float32))
    h1 = 0.5 * h1 * (1.0 + jax.lax.erf(h1 * 0.7071067811865476))   # exact gelu
    ffn = (jnp.dot(h1.astype(jnp.bfloat16), w2_ref[0],
                   preferred_element_type=jnp.float32)
           + b2_ref[0].astype(jnp.float32))
    x = _layernorm(x + ffn, ln2g_ref[0], ln2b_ref[0], eps)

    o_ref[0] = x                                   # carried to next layer in VMEM


# ------------------------------ kernel wrapper ------------------------------ #

def bert_encoder(x_emb, add_mask, params, *, num_heads, eps=LN_EPS):
    """x_emb: (B, S, H) summed embeddings (pre-layernorm); add_mask: (B, 1, S)."""
    B, S, H = x_emb.shape
    L = params["wqkv"].shape[0]
    nH = num_heads
    dh = H // nH
    I = params["w1"].shape[-1]

    kernel = functools.partial(_encoder_kernel, num_heads=num_heads, eps=eps)

    per_batch = lambda b, l: (b, 0, 0)     # resident across the layer axis
    const2 = lambda b, l: (0, 0)
    layer3 = lambda b, l: (l, 0, 0)        # one layer's weights per inner step
    layer4 = lambda b, l: (l, 0, 0, 0)

    # TODO(synk): before scaling to BERT-base (H=768, I=3072, S>=128), re-derive
    # the VMEM budget and set vmem_limit_bytes / Buffered depths explicitly.
    return pl.pallas_call(
        kernel,
        out_shape=jax.ShapeDtypeStruct((B, S, H), jnp.float32),
        grid=(B, L),
        in_specs=[
            pl.BlockSpec((1, S, H), per_batch),         # embedded input
            pl.BlockSpec((1, 1, S), per_batch),         # additive key mask
            pl.BlockSpec((1, H), const2),               # emb layernorm gamma
            pl.BlockSpec((1, H), const2),               # emb layernorm beta
            pl.BlockSpec((1, nH, H, 3 * dh), layer4),   # wqkv (head-major)
            pl.BlockSpec((1, nH, 1, 3 * dh), layer4),   # bqkv
            pl.BlockSpec((1, nH, dh, H), layer4),       # wo   (head-major)
            pl.BlockSpec((1, 1, H), layer3),            # bo
            pl.BlockSpec((1, 1, H), layer3),            # ln1 gamma
            pl.BlockSpec((1, 1, H), layer3),            # ln1 beta
            pl.BlockSpec((1, H, I), layer3),            # w1
            pl.BlockSpec((1, 1, I), layer3),            # b1
            pl.BlockSpec((1, I, H), layer3),            # w2
            pl.BlockSpec((1, 1, H), layer3),            # b2
            pl.BlockSpec((1, 1, H), layer3),            # ln2 gamma
            pl.BlockSpec((1, 1, H), layer3),            # ln2 beta
        ],
        out_specs=pl.BlockSpec((1, S, H), per_batch),
        # batch axis -> parallel (v7x megacore); layer axis carries the
        # sequential residual-stream dependency -> arbitrary, innermost.
        compiler_params=pltpu.CompilerParams(
            dimension_semantics=("parallel", "arbitrary")),
    )(x_emb, add_mask,
      params["emb_ln_g"], params["emb_ln_b"],
      params["wqkv"], params["bqkv"], params["wo"], params["bo"],
      params["ln1_g"], params["ln1_b"],
      params["w1"], params["b1"], params["w2"], params["b2"],
      params["ln2_g"], params["ln2_b"])


# ------------------------------ model (glue) -------------------------------- #

def init_params(key, cfg):
    H, I, L = cfg["hidden"], cfg["intermediate"], cfg["num_layers"]
    nH = cfg["num_heads"]
    dh = H // nH
    std = 0.02
    wdt = jnp.bfloat16   # MXU-operand dtype for the dense weights

    def nrm(k, shape):
        return std * jax.random.normal(k, shape, jnp.float32)

    keys = iter(jax.random.split(key, 16))

    # Head-major fused QKV weights: (L, nH, H, 3*dh); within a head the columns
    # are [Q | K | V].  The 1/sqrt(dh) attention scale is folded into the Q
    # columns (and Q bias, here zero) once at init -- zero runtime cost.
    wqkv = nrm(next(keys), (L, nH, H, 3 * dh))
    scale = 1.0 / float(dh) ** 0.5
    wqkv = wqkv.at[..., :dh].multiply(scale)
    bqkv = jnp.zeros((L, nH, 1, 3 * dh), jnp.float32)   # zeros: scale fold is a no-op

    return {
        "word_emb": nrm(next(keys), (cfg["vocab_size"], H)),
        "pos_emb": nrm(next(keys), (cfg["max_pos"], H)),
        "type_emb": nrm(next(keys), (cfg["type_vocab"], H)),
        "emb_ln_g": jnp.ones((1, H), jnp.float32),
        "emb_ln_b": jnp.zeros((1, H), jnp.float32),
        "cls_w": nrm(next(keys), (H, cfg["num_labels"])),
        "cls_b": jnp.zeros((cfg["num_labels"],), jnp.float32),
        # stacked per-layer weights (layer axis first, matched by index_map l)
        "wqkv": wqkv.astype(wdt),
        "bqkv": bqkv,
        "wo": nrm(next(keys), (L, nH, dh, H)).astype(wdt),   # head-major W_O rows
        "bo": jnp.zeros((L, 1, H), jnp.float32),
        "ln1_g": jnp.ones((L, 1, H), jnp.float32),
        "ln1_b": jnp.zeros((L, 1, H), jnp.float32),
        "w1": nrm(next(keys), (L, H, I)).astype(wdt),
        "b1": jnp.zeros((L, 1, I), jnp.float32),
        "w2": nrm(next(keys), (L, I, H)).astype(wdt),
        "b2": jnp.zeros((L, 1, H), jnp.float32),
        "ln2_g": jnp.ones((L, 1, H), jnp.float32),
        "ln2_b": jnp.zeros((L, 1, H), jnp.float32),
    }


def bert_model_forward(params, input_ids, token_type_ids=None, attention_mask=None,
                       *, cfg=CFG):
    B, S = input_ids.shape
    if token_type_ids is None:
        token_type_ids = jnp.zeros_like(input_ids)
    if attention_mask is None:
        attention_mask = jnp.ones_like(input_ids)

    # ---- embeddings (gather lookups stay in XLA glue; their layernorm is fused
    #      into the first grid step of the encoder kernel) ----
    emb = (jnp.take(params["word_emb"], input_ids, axis=0)
           + params["pos_emb"][:S][None, :, :]
           + jnp.take(params["type_emb"], token_type_ids, axis=0))      # (B, S, H)

    # tiny (B, 1, S) additive key mask; the full broadcast happens INSIDE the kernel.
    add_mask = ((1.0 - attention_mask.astype(jnp.float32)) * -10000.0)[:, None, :]

    seq_out = bert_encoder(emb, add_mask, params, num_heads=cfg["num_heads"])

    # CLS head: (B, H) @ (H, 1). N=1 would be a 127/128-lane masked Pallas store,
    # so this tiny matvec stays in XLA glue.
    cls = seq_out[:, 0]
    logits = cls @ params["cls_w"] + params["cls_b"]
    # TODO(synk): the optional CrossEntropyLoss branch (labels is not None) is
    # training-only glue and is not implemented as a kernel.
    return logits


if __name__ == "__main__":
    key = jax.random.PRNGKey(0)
    k_param, k_ids = jax.random.split(key)

    B, S = 2, 8
    params = init_params(k_param, CFG)

    input_ids = jax.random.randint(k_ids, (B, S), 0, CFG["vocab_size"], dtype=jnp.int32)
    token_type_ids = jnp.zeros((B, S), jnp.int32)
    attention_mask = jnp.ones((B, S), jnp.int32)

    fwd = jax.jit(functools.partial(bert_model_forward, cfg=CFG))
    logits = fwd(params, input_ids, token_type_ids, attention_mask)
    jax.block_until_ready(logits)

    assert logits.shape == (B, CFG["num_labels"])
    assert bool(jnp.all(jnp.isfinite(logits)))
    print("KERNEL_OK")
</pallas_src>

<mosaic_0001>
module attributes {stable_mosaic.version = 11 : i64} {
  func.func @_encoder_kernel(%arg0: i32, %arg1: i32, %arg2: memref<1x8x32xf32, #tpu.memory_space<vmem>>, %arg3: memref<1x1x8xf32, #tpu.memory_space<vmem>>, %arg4: memref<1x32xf32, #tpu.memory_space<vmem>>, %arg5: memref<1x32xf32, #tpu.memory_space<vmem>>, %arg6: memref<1x4x32x24xbf16, #tpu.memory_space<vmem>>, %arg7: memref<1x4x1x24xf32, #tpu.memory_space<vmem>>, %arg8: memref<1x4x8x32xbf16, #tpu.memory_space<vmem>>, %arg9: memref<1x1x32xf32, #tpu.memory_space<vmem>>, %arg10: memref<1x1x32xf32, #tpu.memory_space<vmem>>, %arg11: memref<1x1x32xf32, #tpu.memory_space<vmem>>, %arg12: memref<1x32x64xbf16, #tpu.memory_space<vmem>>, %arg13: memref<1x1x64xf32, #tpu.memory_space<vmem>>, %arg14: memref<1x64x32xbf16, #tpu.memory_space<vmem>>, %arg15: memref<1x1x32xf32, #tpu.memory_space<vmem>>, %arg16: memref<1x1x32xf32, #tpu.memory_space<vmem>>, %arg17: memref<1x1x32xf32, #tpu.memory_space<vmem>>, %arg18: memref<1x8x32xf32, #tpu.memory_space<vmem>>) attributes {dimension_semantics = [#tpu.dimension_semantics<parallel>, #tpu.dimension_semantics<arbitrary>], iteration_bounds = array<i64: 2, 2>, scalar_prefetch = 0 : i64, scratch_operands = 0 : i64, tpu.core_type = #tpu.core_type<tc>, window_params = [{transform_indices = @transform_0, window_bounds = array<i64: 1, 8, 32>}, {transform_indices = @transform_1, window_bounds = array<i64: 1, 1, 8>}, {pipeline_mode = #tpu.pipeline_mode<synchronous>, transform_indices = @transform_2, window_bounds = array<i64: 1, 32>}, {pipeline_mode = #tpu.pipeline_mode<synchronous>, transform_indices = @transform_3, window_bounds = array<i64: 1, 32>}, {transform_indices = @transform_4, window_bounds = array<i64: 1, 4, 32, 24>}, {transform_indices = @transform_5, window_bounds = array<i64: 1, 4, 1, 24>}, {transform_indices = @transform_6, window_bounds = array<i64: 1, 4, 8, 32>}, {transform_indices = @transform_7, window_bounds = array<i64: 1, 1, 32>}, {transform_indices = @transform_8, window_bounds = array<i64: 1, 1, 32>}, {transform_indices = @transform_9, window_bounds = array<i64: 1, 1, 32>}, {transform_indices = @transform_10, window_bounds = array<i64: 1, 32, 64>}, {transform_indices = @transform_11, window_bounds = array<i64: 1, 1, 64>}, {transform_indices = @transform_12, window_bounds = array<i64: 1, 64, 32>}, {transform_indices = @transform_13, window_bounds = array<i64: 1, 1, 32>}, {transform_indices = @transform_14, window_bounds = array<i64: 1, 1, 32>}, {transform_indices = @transform_15, window_bounds = array<i64: 1, 1, 32>}, {transform_indices = @transform_16, window_bounds = array<i64: 1, 8, 32>}]} {
    %c0_i32 = arith.constant 0 : i32
    %0 = arith.cmpi eq, %arg1, %c0_i32 : i32
    %1 = arith.extui %0 : i1 to i32
    %c0_i32_0 = arith.constant 0 : i32
    %2 = arith.cmpi ne, %1, %c0_i32_0 : i32
    scf.if %2 {
      %c0_69 = arith.constant 0 : index
      %c0_70 = arith.constant 0 : index
      %c0_71 = arith.constant 0 : index
      %128 = vector.load %arg2[%c0_69, %c0_70, %c0_71] : memref<1x8x32xf32, #tpu.memory_space<vmem>>, vector<1x8x32xf32>
      %129 = vector.shape_cast %128 : vector<1x8x32xf32> to vector<8x32xf32>
      %c0_72 = arith.constant 0 : index
      %c0_73 = arith.constant 0 : index
      %130 = vector.load %arg4[%c0_72, %c0_73] : memref<1x32xf32, #tpu.memory_space<vmem>>, vector<1x32xf32>
      %c0_74 = arith.constant 0 : index
      %c0_75 = arith.constant 0 : index
      %131 = vector.load %arg5[%c0_74, %c0_75] : memref<1x32xf32, #tpu.memory_space<vmem>>, vector<1x32xf32>
      %cst_76 = arith.constant dense<0.000000e+00> : vector<8xf32>
      %132 = vector.multi_reduction <add>, %129, %cst_76 [1] : vector<8x32xf32> to vector<8xf32>
      %133 = vector.shape_cast %132 : vector<8xf32> to vector<8x1xf32>
      %cst_77 = arith.constant 3.200000e+01 : f32
      %134 = vector.broadcast %cst_77 : f32 to vector<8x1xf32>
      %135 = arith.divf %133, %134 : vector<8x1xf32>
      %136 = vector.broadcast %135 : vector<8x1xf32> to vector<8x32xf32>
      %137 = arith.subf %129, %136 : vector<8x32xf32>
      %138 = arith.mulf %137, %137 : vector<8x32xf32>
      %cst_78 = arith.constant dense<0.000000e+00> : vector<8xf32>
      %139 = vector.multi_reduction <add>, %138, %cst_78 [1] : vector<8x32xf32> to vector<8xf32>
      %140 = vector.shape_cast %139 : vector<8xf32> to vector<8x1xf32>
      %cst_79 = arith.constant 3.200000e+01 : f32
      %141 = vector.broadcast %cst_79 : f32 to vector<8x1xf32>
      %142 = arith.divf %140, %141 : vector<8x1xf32>
      %143 = vector.broadcast %135 : vector<8x1xf32> to vector<8x32xf32>
      %144 = arith.subf %129, %143 : vector<8x32xf32>
      %cst_80 = arith.constant 9.99999996E-13 : f32
      %145 = vector.broadcast %cst_80 : f32 to vector<8x1xf32>
      %146 = arith.addf %142, %145 : vector<8x1xf32>
      %147 = math.rsqrt %146 : vector<8x1xf32>
      %148 = vector.broadcast %147 : vector<8x1xf32> to vector<8x32xf32>
      %149 = arith.mulf %144, %148 : vector<8x32xf32>
      %150 = vector.broadcast %130 : vector<1x32xf32> to vector<8x32xf32>
      %151 = arith.mulf %149, %150 : vector<8x32xf32>
      %152 = vector.broadcast %131 : vector<1x32xf32> to vector<8x32xf32>
      %153 = arith.addf %151, %152 : vector<8x32xf32>
      %c0_81 = arith.constant 0 : index
      %c0_82 = arith.constant 0 : index
      %c0_83 = arith.constant 0 : index
      %154 = vector.load %arg18[%c0_81, %c0_82, %c0_83] : memref<1x8x32xf32, #tpu.memory_space<vmem>>, vector<1x8x32xf32>
      %155 = vector.shape_cast %154 : vector<1x8x32xf32> to vector<8x32xf32>
      %156 = vector.shape_cast %153 : vector<8x32xf32> to vector<1x8x32xf32>
      tpu.vector_store %arg18[%c0_81, %c0_82, %c0_83], %156 {strides = array<i32>} : memref<1x8x32xf32, #tpu.memory_space<vmem>>, vector<1x8x32xf32>,
    } else {
    }
    %c0 = arith.constant 0 : index
    %c0_1 = arith.constant 0 : index
    %c0_2 = arith.constant 0 : index
    %3 = vector.load %arg18[%c0, %c0_1, %c0_2] : memref<1x8x32xf32, #tpu.memory_space<vmem>>, vector<1x8x32xf32>
    %4 = vector.shape_cast %3 : vector<1x8x32xf32> to vector<8x32xf32>
    %5 = arith.truncf %4 : vector<8x32xf32> to vector<8x32xbf16>
    %6 = vector.shape_cast %5 : vector<8x32xbf16> to vector<1x8x32xbf16>
    %7 = vector.shape_cast %6 : vector<1x8x32xbf16> to vector<1x8x32xbf16>
    %8 = vector.broadcast %7 : vector<1x8x32xbf16> to vector<4x8x32xbf16>
    %c0_3 = arith.constant 0 : index
    %c0_4 = arith.constant 0 : index
    %c0_5 = arith.constant 0 : index
    %c0_6 = arith.constant 0 : index
    %9 = vector.load %arg6[%c0_3, %c0_4, %c0_5, %c0_6] : memref<1x4x32x24xbf16, #tpu.memory_space<vmem>>, vector<1x4x32x24xbf16>
    %10 = vector.shape_cast %9 : vector<1x4x32x24xbf16> to vector<4x32x24xbf16>
    "tpu.trace_start"() <{level = 10 : i32, message = "hse,hec->hsc"}> : () -> ()
    %cst = arith.constant dense<0.000000e+00> : vector<4x8x24xf32>
    %11 = tpu.matmul %8, %10, %cst {dimension_numbers = #tpu.dot_dimension_numbers<[2], [1], [1], [2], [0, 0, 0, 1, 1, 2], [0], [0]>} : vector<4x8x32xbf16>, vector<4x32x24xbf16>, vector<4x8x24xf32> -> vector<4x8x24xf32>
    "tpu.trace_stop"() : () -> ()
    %c0_7 = arith.constant 0 : index
    %c0_8 = arith.constant 0 : index
    %c0_9 = arith.constant 0 : index
    %c0_10 = arith.constant 0 : index
    %12 = vector.load %arg7[%c0_7, %c0_8, %c0_9, %c0_10] : memref<1x4x1x24xf32, #tpu.memory_space<vmem>>, vector<1x4x1x24xf32>
    %13 = vector.shape_cast %12 : vector<1x4x1x24xf32> to vector<4x1x24xf32>
    %14 = vector.broadcast %13 : vector<4x1x24xf32> to vector<4x8x24xf32>
    %15 = arith.addf %11, %14 : vector<4x8x24xf32>
    %16 = vector.extract_strided_slice %15 {offsets = [0, 0, 0], sizes = [4, 8, 8], strides = [1, 1, 1]} : vector<4x8x24xf32> to vector<4x8x8xf32>
    %17 = vector.extract_strided_slice %15 {offsets = [0, 0, 8], sizes = [4, 8, 8], strides = [1, 1, 1]} : vector<4x8x24xf32> to vector<4x8x8xf32>
    %18 = vector.extract_strided_slice %15 {offsets = [0, 0, 16], sizes = [4, 8, 8], strides = [1, 1, 1]} : vector<4x8x24xf32> to vector<4x8x8xf32>
    %c0_11 = arith.constant 0 : index
    %c0_12 = arith.constant 0 : index
    %c0_13 = arith.constant 0 : index
    %19 = vector.load %arg3[%c0_11, %c0_12, %c0_13] : memref<1x1x8xf32, #tpu.memory_space<vmem>>, vector<1x1x8xf32>
    %20 = arith.truncf %16 : vector<4x8x8xf32> to vector<4x8x8xbf16>
    %21 = arith.truncf %17 : vector<4x8x8xf32> to vector<4x8x8xbf16>
    "tpu.trace_start"() <{level = 10 : i32, message = "hqd,hkd->hqk"}> : () -> ()
    %cst_14 = arith.constant dense<0.000000e+00> : vector<4x8x8xf32>
    %22 = tpu.matmul %20, %21, %cst_14 {dimension_numbers = #tpu.dot_dimension_numbers<[2], [2], [1], [1], [0, 0, 0, 1, 1, 1], [0], [0]>} : vector<4x8x8xbf16>, vector<4x8x8xbf16>, vector<4x8x8xf32> -> vector<4x8x8xf32>
    "tpu.trace_stop"() : () -> ()
    %23 = vector.broadcast %19 : vector<1x1x8xf32> to vector<4x8x8xf32>
    %24 = arith.addf %22, %23 : vector<4x8x8xf32>
    %cst_15 = arith.constant dense<0xFF800000> : vector<4x8xf32>
    %25 = vector.multi_reduction <maximumf>, %24, %cst_15 [2] : vector<4x8x8xf32> to vector<4x8xf32>
    %26 = vector.shape_cast %25 : vector<4x8xf32> to vector<4x8x1xf32>
    %27 = vector.broadcast %26 : vector<4x8x1xf32> to vector<4x8x8xf32>
    %28 = arith.subf %24, %27 : vector<4x8x8xf32>
    %29 = math.exp %28 : vector<4x8x8xf32>
    %cst_16 = arith.constant dense<0.000000e+00> : vector<4x8xf32>
    %30 = vector.multi_reduction <add>, %29, %cst_16 [2] : vector<4x8x8xf32> to vector<4x8xf32>
    %31 = vector.shape_cast %30 : vector<4x8xf32> to vector<4x8x1xf32>
    %32 = tpu.reciprocal %31 {approx = true} : vector<4x8x1xf32> -> vector<4x8x1xf32>
    %33 = vector.broadcast %32 : vector<4x8x1xf32> to vector<4x8x8xf32>
    %34 = arith.mulf %29, %33 : vector<4x8x8xf32>
    %35 = arith.truncf %34 : vector<4x8x8xf32> to vector<4x8x8xbf16>
    %36 = arith.truncf %18 : vector<4x8x8xf32> to vector<4x8x8xbf16>
    "tpu.trace_start"() <{level = 10 : i32, message = "hqk,hkd->hqd"}> : () -> ()
    %cst_17 = arith.constant dense<0.000000e+00> : vector<4x8x8xf32>
    %37 = tpu.matmul %35, %36, %cst_17 {dimension_numbers = #tpu.dot_dimension_numbers<[2], [1], [1], [2], [0, 0, 0, 1, 1, 2], [0], [0]>} : vector<4x8x8xbf16>, vector<4x8x8xbf16>, vector<4x8x8xf32> -> vector<4x8x8xf32>
    "tpu.trace_stop"() : () -> ()
    %38 = arith.truncf %37 : vector<4x8x8xf32> to vector<4x8x8xbf16>
    %c0_18 = arith.constant 0 : index
    %c0_19 = arith.constant 0 : index
    %c0_20 = arith.constant 0 : index
    %c0_21 = arith.constant 0 : index
    %39 = vector.load %arg8[%c0_18, %c0_19, %c0_20, %c0_21] : memref<1x4x8x32xbf16, #tpu.memory_space<vmem>>, vector<1x4x8x32xbf16>
    %40 = vector.shape_cast %39 : vector<1x4x8x32xbf16> to vector<4x8x32xbf16>
    "tpu.trace_start"() <{level = 10 : i32, message = "hqd,hde->hqe"}> : () -> ()
    %cst_22 = arith.constant dense<0.000000e+00> : vector<4x8x32xf32>
    %41 = tpu.matmul %38, %40, %cst_22 {dimension_numbers = #tpu.dot_dimension_numbers<[2], [1], [1], [2], [0, 0, 0, 1, 1, 2], [0], [0]>} : vector<4x8x8xbf16>, vector<4x8x32xbf16>, vector<4x8x32xf32> -> vector<4x8x32xf32>
    "tpu.trace_stop"() : () -> ()
    %cst_23 = arith.constant dense<0.000000e+00> : vector<8x32xf32>
    %42 = vector.multi_reduction <add>, %41, %cst_23 [0] : vector<4x8x32xf32> to vector<8x32xf32>
    %c0_24 = arith.constant 0 : index
    %c0_25 = arith.constant 0 : index
    %c0_26 = arith.constant 0 : index
    %43 = vector.load %arg9[%c0_24, %c0_25, %c0_26] : memref<1x1x32xf32, #tpu.memory_space<vmem>>, vector<1x1x32xf32>
    %44 = vector.shape_cast %43 : vector<1x1x32xf32> to vector<1x32xf32>
    %45 = vector.broadcast %44 : vector<1x32xf32> to vector<8x32xf32>
    %46 = arith.addf %42, %45 : vector<8x32xf32>
    %47 = arith.addf %4, %46 : vector<8x32xf32>
    %c0_27 = arith.constant 0 : index
    %c0_28 = arith.constant 0 : index
    %c0_29 = arith.constant 0 : index
    %48 = vector.load %arg10[%c0_27, %c0_28, %c0_29] : memref<1x1x32xf32, #tpu.memory_space<vmem>>, vector<1x1x32xf32>
    %49 = vector.shape_cast %48 : vector<1x1x32xf32> to vector<1x32xf32>
    %c0_30 = arith.constant 0 : index
    %c0_31 = arith.constant 0 : index
    %c0_32 = arith.constant 0 : index
    %50 = vector.load %arg11[%c0_30, %c0_31, %c0_32] : memref<1x1x32xf32, #tpu.memory_space<vmem>>, vector<1x1x32xf32>
    %51 = vector.shape_cast %50 : vector<1x1x32xf32> to vector<1x32xf32>
    %cst_33 = arith.constant dense<0.000000e+00> : vector<8xf32>
    %52 = vector.multi_reduction <add>, %47, %cst_33 [1] : vector<8x32xf32> to vector<8xf32>
    %53 = vector.shape_cast %52 : vector<8xf32> to vector<8x1xf32>
    %cst_34 = arith.constant 3.200000e+01 : f32
    %54 = vector.broadcast %cst_34 : f32 to vector<8x1xf32>
    %55 = arith.divf %53, %54 : vector<8x1xf32>
    %56 = vector.broadcast %55 : vector<8x1xf32> to vector<8x32xf32>
    %57 = arith.subf %47, %56 : vector<8x32xf32>
    %58 = arith.mulf %57, %57 : vector<8x32xf32>
    %cst_35 = arith.constant dense<0.000000e+00> : vector<8xf32>
    %59 = vector.multi_reduction <add>, %58, %cst_35 [1] : vector<8x32xf32> to vector<8xf32>
    %60 = vector.shape_cast %59 : vector<8xf32> to vector<8x1xf32>
    %cst_36 = arith.constant 3.200000e+01 : f32
    %61 = vector.broadcast %cst_36 : f32 to vector<8x1xf32>
    %62 = arith.divf %60, %61 : vector<8x1xf32>
    %63 = vector.broadcast %55 : vector<8x1xf32> to vector<8x32xf32>
    %64 = arith.subf %47, %63 : vector<8x32xf32>
    %cst_37 = arith.constant 9.99999996E-13 : f32
    %65 = vector.broadcast %cst_37 : f32 to vector<8x1xf32>
    %66 = arith.addf %62, %65 : vector<8x1xf32>
    %67 = math.rsqrt %66 : vector<8x1xf32>
    %68 = vector.broadcast %67 : vector<8x1xf32> to vector<8x32xf32>
    %69 = arith.mulf %64, %68 : vector<8x32xf32>
    %70 = vector.broadcast %49 : vector<1x32xf32> to vector<8x32xf32>
    %71 = arith.mulf %69, %70 : vector<8x32xf32>
    %72 = vector.broadcast %51 : vector<1x32xf32> to vector<8x32xf32>
    %73 = arith.addf %71, %72 : vector<8x32xf32>
    %74 = arith.truncf %73 : vector<8x32xf32> to vector<8x32xbf16>
    %c0_38 = arith.constant 0 : index
    %c0_39 = arith.constant 0 : index
    %c0_40 = arith.constant 0 : index
    %75 = vector.load %arg12[%c0_38, %c0_39, %c0_40] : memref<1x32x64xbf16, #tpu.memory_space<vmem>>, vector<1x32x64xbf16>
    %76 = vector.shape_cast %75 : vector<1x32x64xbf16> to vector<32x64xbf16>
    %cst_41 = arith.constant dense<0.000000e+00> : vector<8x64xf32>
    %77 = tpu.matmul %74, %76, %cst_41 {dimension_numbers = #tpu.dot_dimension_numbers<[1], [0], [0], [1], [0, 0, 1, 1], [], []>} : vector<8x32xbf16>, vector<32x64xbf16>, vector<8x64xf32> -> vector<8x64xf32>
    %c0_42 = arith.constant 0 : index
    %c0_43 = arith.constant 0 : index
    %c0_44 = arith.constant 0 : index
    %78 = vector.load %arg13[%c0_42, %c0_43, %c0_44] : memref<1x1x64xf32, #tpu.memory_space<vmem>>, vector<1x1x64xf32>
    %79 = vector.shape_cast %78 : vector<1x1x64xf32> to vector<1x64xf32>
    %80 = vector.broadcast %79 : vector<1x64xf32> to vector<8x64xf32>
    %81 = arith.addf %77, %80 : vector<8x64xf32>
    %cst_45 = arith.constant 5.000000e-01 : f32
    %82 = vector.broadcast %cst_45 : f32 to vector<8x64xf32>
    %83 = arith.mulf %82, %81 : vector<8x64xf32>
    %cst_46 = arith.constant 0.707106769 : f32
    %84 = vector.broadcast %cst_46 : f32 to vector<8x64xf32>
    %85 = arith.mulf %81, %84 : vector<8x64xf32>
    %86 = math.erf %85 : vector<8x64xf32>
    %cst_47 = arith.constant 1.000000e+00 : f32
    %87 = vector.broadcast %cst_47 : f32 to vector<8x64xf32>
    %88 = arith.addf %87, %86 : vector<8x64xf32>
    %89 = arith.mulf %83, %88 : vector<8x64xf32>
    %90 = arith.truncf %89 : vector<8x64xf32> to vector<8x64xbf16>
    %c0_48 = arith.constant 0 : index
    %c0_49 = arith.constant 0 : index
    %c0_50 = arith.constant 0 : index
    %91 = vector.load %arg14[%c0_48, %c0_49, %c0_50] : memref<1x64x32xbf16, #tpu.memory_space<vmem>>, vector<1x64x32xbf16>
    %92 = vector.shape_cast %91 : vector<1x64x32xbf16> to vector<64x32xbf16>
    %cst_51 = arith.constant dense<0.000000e+00> : vector<8x32xf32>
    %93 = tpu.matmul %90, %92, %cst_51 {dimension_numbers = #tpu.dot_dimension_numbers<[1], [0], [0], [1], [0, 0, 1, 1], [], []>} : vector<8x64xbf16>, vector<64x32xbf16>, vector<8x32xf32> -> vector<8x32xf32>
    %c0_52 = arith.constant 0 : index
    %c0_53 = arith.constant 0 : index
    %c0_54 = arith.constant 0 : index
    %94 = vector.load %arg15[%c0_52, %c0_53, %c0_54] : memref<1x1x32xf32, #tpu.memory_space<vmem>>, vector<1x1x32xf32>
    %95 = vector.shape_cast %94 : vector<1x1x32xf32> to vector<1x32xf32>
    %96 = vector.broadcast %95 : vector<1x32xf32> to vector<8x32xf32>
    %97 = arith.addf %93, %96 : vector<8x32xf32>
    %98 = arith.addf %73, %97 : vector<8x32xf32>
    %c0_55 = arith.constant 0 : index
    %c0_56 = arith.constant 0 : index
    %c0_57 = arith.constant 0 : index
    %99 = vector.load %arg16[%c0_55, %c0_56, %c0_57] : memref<1x1x32xf32, #tpu.memory_space<vmem>>, vector<1x1x32xf32>
    %100 = vector.shape_cast %99 : vector<1x1x32xf32> to vector<1x32xf32>
    %c0_58 = arith.constant 0 : index
    %c0_59 = arith.constant 0 : index
    %c0_60 = arith.constant 0 : index
    %101 = vector.load %arg17[%c0_58, %c0_59, %c0_60] : memref<1x1x32xf32, #tpu.memory_space<vmem>>, vector<1x1x32xf32>
    %102 = vector.shape_cast %101 : vector<1x1x32xf32> to vector<1x32xf32>
    %cst_61 = arith.constant dense<0.000000e+00> : vector<8xf32>
    %103 = vector.multi_reduction <add>, %98, %cst_61 [1] : vector<8x32xf32> to vector<8xf32>
    %104 = vector.shape_cast %103 : vector<8xf32> to vector<8x1xf32>
    %cst_62 = arith.constant 3.200000e+01 : f32
    %105 = vector.broadcast %cst_62 : f32 to vector<8x1xf32>
    %106 = arith.divf %104, %105 : vector<8x1xf32>
    %107 = vector.broadcast %106 : vector<8x1xf32> to vector<8x32xf32>
    %108 = arith.subf %98, %107 : vector<8x32xf32>
    %109 = arith.mulf %108, %108 : vector<8x32xf32>
    %cst_63 = arith.constant dense<0.000000e+00> : vector<8xf32>
    %110 = vector.multi_reduction <add>, %109, %cst_63 [1] : vector<8x32xf32> to vector<8xf32>
    %111 = vector.shape_cast %110 : vector<8xf32> to vector<8x1xf32>
    %cst_64 = arith.constant 3.200000e+01 : f32
    %112 = vector.broadcast %cst_64 : f32 to vector<8x1xf32>
    %113 = arith.divf %111, %112 : vector<8x1xf32>
    %114 = vector.broadcast %106 : vector<8x1xf32> to vector<8x32xf32>
    %115 = arith.subf %98, %114 : vector<8x32xf32>
    %cst_65 = arith.constant 9.99999996E-13 : f32
    %116 = vector.broadcast %cst_65 : f32 to vector<8x1xf32>
    %117 = arith.addf %113, %116 : vector<8x1xf32>
    %118 = math.rsqrt %117 : vector<8x1xf32>
    %119 = vector.broadcast %118 : vector<8x1xf32> to vector<8x32xf32>
    %120 = arith.mulf %115, %119 : vector<8x32xf32>
    %121 = vector.broadcast %100 : vector<1x32xf32> to vector<8x32xf32>
    %122 = arith.mulf %120, %121 : vector<8x32xf32>
    %123 = vector.broadcast %102 : vector<1x32xf32> to vector<8x32xf32>
    %124 = arith.addf %122, %123 : vector<8x32xf32>
    %c0_66 = arith.constant 0 : index
    %c0_67 = arith.constant 0 : index
    %c0_68 = arith.constant 0 : index
    %125 = vector.load %arg18[%c0_66, %c0_67, %c0_68] : memref<1x8x32xf32, #tpu.memory_space<vmem>>, vector<1x8x32xf32>
    %126 = vector.shape_cast %125 : vector<1x8x32xf32> to vector<8x32xf32>
    %127 = vector.shape_cast %124 : vector<8x32xf32> to vector<1x8x32xf32>
    tpu.vector_store %arg18[%c0_66, %c0_67, %c0_68], %127 {strides = array<i32>} : memref<1x8x32xf32, #tpu.memory_space<vmem>>, vector<1x8x32xf32>,
    return
  }
  func.func @transform_0(%arg0: i32, %arg1: i32) -> (i32, i32, i32) {
    %c0_i32 = arith.constant 0 : i32
    %c0_i32_0 = arith.constant 0 : i32
    %c0_i32_1 = arith.constant 0 : i32
    return %arg0, %c0_i32, %c0_i32_0 : i32, i32, i32
  }
  func.func @transform_1(%arg0: i32, %arg1: i32) -> (i32, i32, i32) {
    %c0_i32 = arith.constant 0 : i32
    %c0_i32_0 = arith.constant 0 : i32
    %c0_i32_1 = arith.constant 0 : i32
    return %arg0, %c0_i32, %c0_i32_0 : i32, i32, i32
  }
  func.func @transform_2(%arg0: i32, %arg1: i32) -> (i32, i32) {
    %c0_i32 = arith.constant 0 : i32
    %c0_i32_0 = arith.constant 0 : i32
    %c0_i32_1 = arith.constant 0 : i32
    return %c0_i32, %c0_i32_0 : i32, i32
  }
  func.func @transform_3(%arg0: i32, %arg1: i32) -> (i32, i32) {
    %c0_i32 = arith.constant 0 : i32
    %c0_i32_0 = arith.constant 0 : i32
    %c0_i32_1 = arith.constant 0 : i32
    return %c0_i32, %c0_i32_0 : i32, i32
  }
  func.func @transform_4(%arg0: i32, %arg1: i32) -> (i32, i32, i32, i32) {
    %c0_i32 = arith.constant 0 : i32
    %c0_i32_0 = arith.constant 0 : i32
    %c0_i32_1 = arith.constant 0 : i32
    %c0_i32_2 = arith.constant 0 : i32
    return %arg1, %c0_i32, %c0_i32_0, %c0_i32_1 : i32, i32, i32, i32
  }
  func.func @transform_5(%arg0: i32, %arg1: i32) -> (i32, i32, i32, i32) {
    %c0_i32 = arith.constant 0 : i32
    %c0_i32_0 = arith.constant 0 : i32
    %c0_i32_1 = arith.constant 0 : i32
    %c0_i32_2 = arith.constant 0 : i32
    return %arg1, %c0_i32, %c0_i32_0, %c0_i32_1 : i32, i32, i32, i32
  }
  func.func @transform_6(%arg0: i32, %arg1: i32) -> (i32, i32, i32, i32) {
    %c0_i32 = arith.constant 0 : i32
    %c0_i32_0 = arith.constant 0 : i32
    %c0_i32_1 = arith.constant 0 : i32
    %c0_i32_2 = arith.constant 0 : i32
    return %arg1, %c0_i32, %c0_i32_0, %c0_i32_1 : i32, i32, i32, i32
  }
  func.func @transform_7(%arg0: i32, %arg1: i32) -> (i32, i32, i32) {
    %c0_i32 = arith.constant 0 : i32
    %c0_i32_0 = arith.constant 0 : i32
    %c0_i32_1 = arith.constant 0 : i32
    return %arg1, %c0_i32, %c0_i32_0 : i32, i32, i32
  }
  func.func @transform_8(%arg0: i32, %arg1: i32) -> (i32, i32, i32) {
    %c0_i32 = arith.constant 0 : i32
    %c0_i32_0 = arith.constant 0 : i32
    %c0_i32_1 = arith.constant 0 : i32
    return %arg1, %c0_i32, %c0_i32_0 : i32, i32, i32
  }
  func.func @transform_9(%arg0: i32, %arg1: i32) -> (i32, i32, i32) {
    %c0_i32 = arith.constant 0 : i32
    %c0_i32_0 = arith.constant 0 : i32
    %c0_i32_1 = arith.constant 0 : i32
    return %arg1, %c0_i32, %c0_i32_0 : i32, i32, i32
  }
  func.func @transform_10(%arg0: i32, %arg1: i32) -> (i32, i32, i32) {
    %c0_i32 = arith.constant 0 : i32
    %c0_i32_0 = arith.constant 0 : i32
    %c0_i32_1 = arith.constant 0 : i32
    return %arg1, %c0_i32, %c0_i32_0 : i32, i32, i32
  }
  func.func @transform_11(%arg0: i32, %arg1: i32) -> (i32, i32, i32) {
    %c0_i32 = arith.constant 0 : i32
    %c0_i32_0 = arith.constant 0 : i32
    %c0_i32_1 = arith.constant 0 : i32
    return %arg1, %c0_i32, %c0_i32_0 : i32, i32, i32
  }
  func.func @transform_12(%arg0: i32, %arg1: i32) -> (i32, i32, i32) {
    %c0_i32 = arith.constant 0 : i32
    %c0_i32_0 = arith.constant 0 : i32
    %c0_i32_1 = arith.constant 0 : i32
    return %arg1, %c0_i32, %c0_i32_0 : i32, i32, i32
  }
  func.func @transform_13(%arg0: i32, %arg1: i32) -> (i32, i32, i32) {
    %c0_i32 = arith.constant 0 : i32
    %c0_i32_0 = arith.constant 0 : i32
    %c0_i32_1 = arith.constant 0 : i32
    return %arg1, %c0_i32, %c0_i32_0 : i32, i32, i32
  }
  func.func @transform_14(%arg0: i32, %arg1: i32) -> (i32, i32, i32) {
    %c0_i32 = arith.constant 0 : i32
    %c0_i32_0 = arith.constant 0 : i32
    %c0_i32_1 = arith.constant 0 : i32
    return %arg1, %c0_i32, %c0_i32_0 : i32, i32, i32
  }
  func.func @transform_15(%arg0: i32, %arg1: i32) -> (i32, i32, i32) {
    %c0_i32 = arith.constant 0 : i32
    %c0_i32_0 = arith.constant 0 : i32
    %c0_i32_1 = arith.constant 0 : i32
    return %arg1, %c0_i32, %c0_i32_0 : i32, i32, i32
  }
  func.func @transform_16(%arg0: i32, %arg1: i32) -> (i32, i32, i32) {
    %c0_i32 = arith.constant 0 : i32
    %c0_i32_0 = arith.constant 0 : i32
    %c0_i32_1 = arith.constant 0 : i32
    return %arg0, %c0_i32, %c0_i32_0 : i32, i32, i32
  }
}

</mosaic_0001>

<bundles_post_ra>
// kernel: bert_model_forward.1
= control target key start
LH: loop header
LB: loop body
LE: loop exit
PB: predicated region body
PF: predicated region fallthrough
CT: control target
= control target key end

     0   :  { %s2552_s21 = smov 0   ;;  %s2554_s22 = smov 0   ;;  %s2887_s0 = inlined_call_operand.vmem [shape: f32[2,8,32], index: 0, kind: input, shape index: {}]   ;;  %s2888_s1 = inlined_call_operand.vmem [shape: f32[2,1,8], index: 1, kind: input, shape index: {}]   ;;  %s2889_s2 = inlined_call_operand.vmem [shape: f32[1,32], index: 2, kind: input, shape index: {}]   ;;  %s2890_s3 = inlined_call_operand.vmem [shape: f32[1,32], index: 3, kind: input, shape index: {}]   ;;  %s2891_s4 = inlined_call_operand.vmem [shape: bf16[2,4,32,24], index: 4, kind: input, shape index: {}]   ;;  %s2892_s5 = inlined_call_operand.vmem [shape: f32[2,4,1,24], index: 5, kind: input, shape index: {}]   ;;  %s2893_s6 = inlined_call_operand.vmem [shape: bf16[2,4,8,32], index: 6, kind: input, shape index: {}]   ;;  %s2894_s7 = inlined_call_operand.vmem [shape: f32[2,1,32], index: 7, kind: input, shape index: {}]   ;;  %s2895_s8 = inlined_call_operand.vmem [shape: f32[2,1,32], index: 8, kind: input, shape index: {}]   ;;  %s2896_s9 = inlined_call_operand.vmem [shape: f32[2,1,32], index: 9, kind: input, shape index: {}]   ;;  %s2897_s10 = inlined_call_operand.vmem [shape: bf16[2,32,64], index: 10, kind: input, shape index: {}]   ;;  %s2898_s11 = inlined_call_operand.vmem [shape: f32[2,1,64], index: 11, kind: input, shape index: {}]   ;;  %s2899_s12 = inlined_call_operand.vmem [shape: bf16[2,64,32], index: 12, kind: input, shape index: {}]   ;;  %s2900_s13 = inlined_call_operand.vmem [shape: f32[2,1,32], index: 13, kind: input, shape index: {}]   ;;  %s2901_s14 = inlined_call_operand.vmem [shape: f32[2,1,32], index: 14, kind: input, shape index: {}]   ;;  %s2902_s15 = inlined_call_operand.vmem [shape: f32[2,1,32], index: 15, kind: input, shape index: {}]   ;;  %s2903_s16 = inlined_call_operand.vmem [shape: f32[2,8,32], index: 16, kind: output, shape index: {}]  }
   0x1   :  { %2910 = sst [smem:[#allocation10_spill]] %s2887_s0  ;;  %s2556_s23 = smov 0  }
   0x2   :  { %2911 = sst [smem:[#allocation11_spill]] %s2888_s1  ;;  %s2558_s24 = smov 0  }
   0x3   :  { %2912 = sst [smem:[#allocation12_spill]] %s2889_s2  ;;  %s2560_s25 = smov 0  }
   0x4   :  { %2913 = sst [smem:[#allocation13_spill]] %s2890_s3 }
   0x5   :  { %2914 = sst [smem:[#allocation14_spill]] %s2891_s4 }
   0x6   :  { %2915 = sst [smem:[#allocation15_spill]] %s2892_s5 }
   0x7   :  { %2916 = sst [smem:[#allocation16_spill]] %s2893_s6 }
   0x8   :  { %2917 = sst [smem:[#allocation17_spill]] %s2897_s10 }
   0x9   :  { %2918 = sst [smem:[#allocation18_spill]] %s2903_s16 }
   0xa LB: > { %2919 = sst [smem:[#allocation2_spill]] %s2445_s21  ;;  %s35_s26 = sadd.s32 1, %s2453_s23  ;;  %s2461_s25 = sphi %s2560_s25, %s26_s25   ;;  %s2457_s24 = sphi %s2558_s24, %s2949_s24   ;;  %s2453_s23 = sphi %s2556_s23, %s2948_s23   ;;  %s2449_s22 = sphi %s2554_s22, %s2947_s22   ;;  %s2445_s21 = sphi %s2552_s21, %s2946_s21  }
   0xb   : > { %2920 = sst [smem:[#allocation3_spill]] %s2453_s23  ;;  %s38_s27 = sadd.s32 1, %s2457_s24 }
   0xc   : > { %2921 = sst [smem:[#allocation4_spill]] %s2457_s24  ;;  %p36_p0 = scmp.ge.s32.totalorder %s35_s26, 2 }
   0xd   : > { %2922 = sst [smem:[#allocation5_spill]] %s2461_s25  ;;  %p2108_p1 = scmp.ge.s32.totalorder %s2461_s25, 1 }
   0xe   : > { %p586_p2 = scmp.lt.s32.totalorder %s2461_s25, 5  ;;  %s2951_s26 = smov (%p36_p0, %s35_s26), 0 }
   0xf   : > { %2923 = sst [smem:[#allocation6_spill]] %s2951_s26  ;;  %s2953_s27 = smov (!%p36_p0, %s38_s27), %s2457_s24 }
  0x10   : > { %p587_p3 = pnand %p2108_p1, %p586_p2  ;;  %p40_p4 = scmp.ge.s32.totalorder %s2953_s27, 2 }
  0x12   : > { %s2955_s27 = smov (%p40_p4, %s2953_s27), 0  ;;  %590 = sbr.rel (%p587_p3) target bundleno = 2634 (0xa4a), region = 84 }
  0x13   : > { %2924 = sst [smem:[#allocation7_spill]] %s2955_s27 }
  0x17   : > { %p682_p5 = scmp.lt.s32.totalorder %s2449_s22, 1  ;;  %p689_p6 = scmp.lt.s32.totalorder %s2445_s21, 1 }
  0x18   : > { %s2927_s20 = sld [smem:[#allocation10_spill]] }
  0x19   : > { %s2957_s22 = smov (!%p682_p5, %s2449_s22), 1  ;;  %s2928_s4 = sld [smem:[#allocation14_spill]] }
  0x1a   : > { %2925 = sst [smem:[#allocation8_spill]] %s2957_s22  ;;  %s2109_s29 = sshll.u32 %s2957_s22, 3 }
  0x1b   : > { %s2588_s28 = scalar_select %p689_p6, %s2445_s21, 1 }
  0x1c   : > { %s2929_s5 = sld [smem:[#allocation15_spill]] }
  0x1d   : > { %s2169_s26 = sshll.u32 %s2588_s28, 6  ;;  %s2112_s3 = sshll.u32 %s2588_s28, 2 }
  0x1e   : > { %s685_s27 = scalar_lea.vmem %s2927_s20, %s2109_s29  ;;  %s2170_s30 = sshll.u32 %s2588_s28, 4 }
  0x1f   : > { %s2602_s25 = scalar_lea.vmem %s2928_s4, %s2169_s26  ;;  %s2930_s6 = sld [smem:[#allocation16_spill]] }
  0x20   : > { %s2932_s10 = sld [smem:[#allocation17_spill]]  ;;  %s727_s1 = scalar_lea.vmem %s2900_s13, %s2588_s28 }
  0x21   : > { %s733_s2 = scalar_lea.vmem %s2902_s15, %s2588_s28  ;;  %s2934_s19 = sld [smem:[#allocation2_spill]] }
  0x22   : > { %s2608_s16 = scalar_lea.vmem %s2929_s5, %s2112_s3  ;;  %s730_s3 = scalar_lea.vmem %s2901_s14, %s2588_s28 }
  0x25   : > { %s2614_s18 = scalar_lea.vmem %s2930_s6, %s2170_s30  ;;  %s2933_s6 = sld [smem:[#allocation18_spill]] }
  0x26   : > { %2931 = sst [smem:[#allocation9_spill]] %s2614_s18  ;;  %s2631_s5 = scalar_lea.vmem %s2932_s10, %s2170_s30 }
  0x27   : > { %s2172_s18 = sshll.u32 %s2588_s28, 5  ;;  %p2120_p7 = scmp.ne.s32.totalorder %s2934_s19, 0 }
  0x28   : > { %s2645_s24 = scalar_lea.vmem %s2899_s12, %s2172_s18  ;;  %s2936_s22 = sld [smem:[#allocation13_spill]] (!%p2120_p7) }
  0x29   : > { %742 = sbr.rel (%p2120_p7) target bundleno = 356 (0x164), region = 88 }
  0x2b   : > { %s2658_s10 = scalar_lea.vmem %s2933_s6, %s2109_s29 }
  0x2e   : > { %v743_v0 = vld [vmem:[%s685_s27] sm:$0xff]  ;;  %vm746_vm0 = vcmask 261120   ;;  %s2935_s27 = sld [smem:[#allocation12_spill]] }
  0x2f   : > { %v747_v1 = vsel %vm746_vm0, %v743_v0, 0.0  ;;  %v2122_v13 = vld [vmem:[%s2936_s22] ss:$0 sm:$0xff] }
  0x30   : > { %748 = vadd.xlane.f32.xlu0 %v747_v1 }
  0x34   : > { %v2121_v11 = vld [vmem:[%s2935_s27] ss:$0 sm:$0xff] }
  0xb9   : > { %v749_v2 = vpop.xlane.xlu0 %748 }
  0xba   : > { %v751_v3 = vmul.f32 0.03125, %v749_v2 }
  0xbc   : > { %v752_v4 = vsub.f32 %v743_v0, %v751_v3 }
  0xbe   : > { %v753_v5 = vmul.f32 %v752_v4, %v752_v4 }
  0xc0   : > { %v754_v6 = vsel %vm746_vm0, %v753_v5, 0.0 }
  0xc1   : > { %755 = vadd.xlane.f32.xlu0 %v754_v6 }
 0x14a   : > { %v756_v7 = vpop.xlane.xlu0 %755 }
 0x14b   : > { %v757_v8 = vmul.f32 0.03125, %v756_v7 }
 0x14d   : > { %v758_v9 = vadd.f32 1e-12, %v757_v8 }
 0x14f   : > { %2385 = vrsqrt.f32 %v758_v9 }
 0x15c   : > { %v2386_v10 = vpop.eup %2385 }
 0x15d   : > { %v760_v12 = vmul.f32 %v2386_v10, %v752_v4 }
 0x15f   : > { %v767_v14 = vmul.f32 %v2121_v11, %v760_v12 }
 0x161   : > { %v774_v15 = vadd.f32 %v2122_v13, %v767_v14 }
 0x163   : > { %775 = vst.msk [vmem:[%s2658_s10] sm:$0xff] %vm746_vm0, %v774_v15 }
 0x164 PF: > { %v2387_v16 = vld [vmem:[%s2602_s25 + $0x8] sm:$0xff]   ;;  %v2463_v17 = vmov 0.0   ;;  %v2388_v18 = vld [vmem:[%s2602_s25 + $0x18] sm:$0xff]   ;;  %v2389_v19 = vld [vmem:[%s2602_s25] sm:$0xff]   ;;  %vm2464_vm1 = vmmov 0   ;;  %vm834_vm2 = vcmask 261120   ;;  %s2941_s6 = scalar_lea.vmem %s2894_s7, %s2588_s28  ;;  %s2942_s18 = scalar_lea.vmem %s2895_s8, %s2588_s28 }
 0x165   : > { %2217 = vmatprep.subr.bf16.mxu0 %v2463_v17  ;;  %2225 = vmatprep.subr.bf16.mxu1 %v2463_v17  ;;  %v2390_v20 = vld [vmem:[%s2602_s25 + $0x10] sm:$0xff]   ;;  %v2391_v23 = vld [vmem:[%s2602_s25 + $0x28] sm:$0xff]   ;;  %v2392_v24 = vld [vmem:[%s2602_s25 + $0x38] sm:$0xff]   ;;  %vm1048_vm3 = vcmask 64512   ;;  %s2938_s26 = sld [smem:[#allocation11_spill]]  ;;  %s2466_s21 = smov 112  }
 0x166   : > { %2218 = vmatpush3.bf16.msra.mxu0 %v2387_v16  ;;  %2221 = vmatprep.mubr.msk.bf16.mxu0 %vm2464_vm1, %v2463_v17  ;;  %v2393_v25 = vld [vmem:[%s2602_s25 + $0x20] sm:$0xff]   ;;  %v2394_v26 = vld [vmem:[%s2602_s25 + $0x30] sm:$0xff]   ;;  %s2465_s25 = smov 120   ;;  %vm1295_vm4 = vcmask 1043456   ;;  %s2940_s17 = sld [smem:[#allocation9_spill]]  ;;  %vm1833_vm5 = vcmask 523264  }
 0x167   : > { %2226 = vmatpush3.bf16.msra.mxu1 %v2388_v18  ;;  %2219 = vmatprep.subr.bf16.mxu0 %v2463_v17  ;;  %v2123_v27 = vld [vmem:[%s2608_s16] ss:$0 sm:$0xff]  ;;  %v2124_v28 = vld [vmem:[%s2608_s16 + $0x1] ss:$0 sm:$0xff]  ;;  %v2125_v40 = vld [vmem:[%s2608_s16 + $0x2] ss:$0 sm:$0xff]  ;;  %s2944_s23 = scalar_lea.vmem %s2898_s11, %s2588_s28 }
 0x168   : > { %2227 = vmatprep.subr.bf16.mxu1 %v2463_v17  ;;  %2229 = vmatprep.mubr.msk.bf16.mxu1 %vm2464_vm1, %v2463_v17  ;;  %v2126_v42 = vld [vmem:[%s2608_s16 + $0x3] ss:$0 sm:$0xff]  ;;  %s2937_s16 = sld [smem:[#allocation8_spill]] }
 0x16a   : > { %v2684_v21 = vld [vmem:[%s2658_s10] sm:$0xff]  ;;  %2220 = vmatpush3.bf16.msra.mxu0 %v2389_v19 }
 0x16b   : > { %v777_v22 = vpack.c.bf16 %v2684_v21, %v2684_v21  ;;  %2228 = vmatpush3.bf16.msra.mxu1 %v2390_v20  ;;  %2233 = vmatprep.subr.bf16.mxu0 %v2463_v17 }
 0x16c   : > { %2241 = vmatprep.subr.bf16.mxu1 %v2463_v17 }
 0x16d   : > { %2222 = vmatmul.mubr.msk.bf16.vlgmr.msra.gmra.mxu0 %vm834_vm2, %v777_v22 }
 0x16e   : > { %2230 = vmatmul.mubr.msk.bf16.vlgmr.msra.gmra.mxu1 %vm834_vm2, %v777_v22  ;;  %2234 = vmatpush3.bf16.msra.mxu0 %v2391_v23  ;;  %s2939_s30 = scalar_lea.vmem %s2938_s26, %s2937_s16 }
 0x16f   : > { %2242 = vmatpush3.bf16.msra.mxu1 %v2392_v24  ;;  %2235 = vmatprep.subr.bf16.mxu0 %v2463_v17  ;;  %v2139_v63 = vld [vmem:[%s2939_s30] ss:$0 sm:$0xff] }
 0x170   : > { %2243 = vmatprep.subr.bf16.mxu1 %v2463_v17  ;;  %2237 = vmatprep.mubr.msk.bf16.mxu0 %vm2464_vm1, %v2463_v17 }
 0x171   : > { %2245 = vmatprep.mubr.msk.bf16.mxu1 %vm2464_vm1, %v2463_v17 }
 0x172   : > { %2236 = vmatpush3.bf16.msra.mxu0 %v2393_v25 }
 0x173   : > { %2244 = vmatpush3.bf16.msra.mxu1 %v2394_v26  ;;  %2249 = vmatprep.subr.bf16.mxu0 %v2463_v17 }
 0x174   : > { %2255 = vmatprep.subr.bf16.mxu1 %v2463_v17 }
 0x175   : > { %2238 = vmatmul.mubr.msk.bf16.vlgmr.msra.gmra.mxu0 %vm834_vm2, %v777_v22 }
 0x176   : > { %2246 = vmatmul.mubr.msk.bf16.vlgmr.msra.gmra.mxu1 %vm834_vm2, %v777_v22  ;;  %2251 = vmatprep.mubr.msk.bf16.mxu0 %vm2464_vm1, %v2463_v17 }
 0x177   : > { %2257 = vmatprep.mubr.msk.bf16.mxu1 %vm2464_vm1, %v2463_v17 }
 0x22d   : > { %v872_v29 = vpop.f32.mrf.mxu0 }
 0x22e   : > { %v873_v30 = vadd.f32 %v2123_v27, %v872_v29  ;;  %v924_v31 = vpop.f32.mrf.mxu1 }
 0x22f   : > { %v925_v32 = vadd.f32 %v2124_v28, %v924_v31  ;;  %v2223_v33 = vpop.f32.mrf.mxu0 }
 0x230   : > { %v2712_v34 = vpack.c.bf16 %v873_v30, %v873_v30  ;;  %v2231_v35 = vpop.f32.mrf.mxu1 }
 0x231   : > { %v875_v36 = vpop.f32.mrf.mxu0  ;;  %v2714_v37 = vpack.c.bf16 %v925_v32, %v925_v32 }
 0x232   : > { %v927_v38 = vpop.f32.mrf.mxu1  ;;  %1046 = vrot.lane.b32.xlu0 %v2712_v34, %s2465_s25 }
 0x233   : > { %v2224_v39 = vpop.f32.mrf.mxu0 }
 0x234   : > { %v2232_v41 = vpop.f32.mrf.mxu1 }
 0x235   : > { %v976_v43 = vpop.f32.mrf.mxu0 }
 0x236   : > { %v977_v44 = vadd.f32 %v2125_v40, %v976_v43  ;;  %v1028_v45 = vpop.f32.mrf.mxu1  ;;  %1096 = vrot.lane.b32.xlu0 %v2714_v37, %s2465_s25 }
 0x237   : > { %v1029_v46 = vadd.f32 %v2126_v42, %v1028_v45  ;;  %v2239_v47 = vpop.f32.mrf.mxu0 }
 0x238   : > { %v2720_v48 = vpack.c.bf16 %v977_v44, %v977_v44  ;;  %v2247_v49 = vpop.f32.mrf.mxu1 }
 0x239   : > { %v979_v50 = vpop.f32.mrf.mxu0  ;;  %v2722_v51 = vpack.c.bf16 %v1029_v46, %v1029_v46 }
 0x23a   : > { %v1031_v52 = vpop.f32.mrf.mxu1  ;;  %1145 = vrot.lane.b32.xlu1 %v2720_v48, %s2465_s25 }
 0x23b   : > { %v2240_v53 = vpop.f32.mrf.mxu0 }
 0x23c   : > { %v2248_v54 = vpop.f32.mrf.mxu1 }
 0x23e   : > { %1194 = vrot.lane.b32.xlu1 %v2722_v51, %s2465_s25 }
 0x2a4   : > { %v1047_v55 = vpop.permute.xlu0 %1046 }
 0x2a5   : > { %v1053_v56 = vsel %vm1048_vm3, %v1047_v55, 0 }
 0x2a6   : > { %2250 = vmatpush3.bf16.xpose.msra.mxu0 %v1053_v56 }
 0x2a7   : > { %2261 = vmatprep.subr.bf16.mxu0 %v2463_v17 }
 0x2a8   : > { %v1097_v57 = vpop.permute.xlu0 %1096 }
 0x2a9   : > { %v1102_v58 = vsel %vm1048_vm3, %v1097_v57, 0 }
 0x2aa   : > { %2256 = vmatpush3.bf16.xpose.msra.mxu1 %v1102_v58 }
 0x2ab   : > { %2267 = vmatprep.subr.bf16.mxu1 %v2463_v17 }
 0x2ac   : > { %v1146_v59 = vpop.permute.xlu1 %1145 }
 0x2ad   : > { %v1151_v60 = vsel %vm1048_vm3, %v1146_v59, 0  ;;  %2252 = vmatmul.mubr.msk.bf16.vlgmr.msra.gmra.mxu0 %vm1048_vm3, %v2712_v34 }
 0x2ae   : > { %2262 = vmatpush3.bf16.xpose.msra.mxu0 %v1151_v60  ;;  %2263 = vmatprep.mubr.msk.bf16.mxu0 %vm2464_vm1, %v2463_v17 }
 0x2af   : > { %2273 = vmatprep.subr.bf16.mxu0 %v2463_v17 }
 0x2b0   : > { %v1195_v61 = vpop.permute.xlu1 %1194 }
 0x2b1   : > { %v1200_v62 = vsel %vm1048_vm3, %v1195_v61, 0  ;;  %2258 = vmatmul.mubr.msk.bf16.vlgmr.msra.gmra.mxu1 %vm1048_vm3, %v2714_v37 }
 0x2b2   : > { %2268 = vmatpush3.bf16.xpose.msra.mxu1 %v1200_v62  ;;  %2269 = vmatprep.mubr.msk.bf16.mxu1 %vm2464_vm1, %v2463_v17 }
 0x2b3   : > { %2279 = vmatprep.subr.bf16.mxu1 %v2463_v17 }
 0x2b5   : > { %2264 = vmatmul.mubr.msk.bf16.vlgmr.msra.gmra.mxu0 %vm1048_vm3, %v2720_v48 }
 0x2b6   : > { %2275 = vmatprep.mubr.msk.bf16.mxu0 %vm2464_vm1, %v2463_v17 }
 0x2b9   : > { %2270 = vmatmul.mubr.msk.bf16.vlgmr.msra.gmra.mxu1 %vm1048_vm3, %v2722_v51 }
 0x2ba   : > { %2281 = vmatprep.mubr.msk.bf16.mxu1 %vm2464_vm1, %v2463_v17 }
 0x36d   : > { %v1089_v0 = vpop.f32.mrf.mxu0 }
 0x36e   : > { %v1090_v1 = vadd.f32 %v2139_v63, %v1089_v0 }
 0x36f   : > { %v2253_v2 = vpop.f32.mrf.mxu0 }
 0x370   : > { %v1242_v3 = vsel %vm1048_vm3, %v1090_v1, -inf }
 0x371   : > { %v1138_v4 = vpop.f32.mrf.mxu1  ;;  %1243 = vmax.xlane.f32.xlu0 %v1242_v3  ;;  %v1092_v5 = vpop.f32.mrf.mxu0 }
 0x372   : > { %v1139_v6 = vadd.f32 %v2139_v63, %v1138_v4 }
 0x373   : > { %v2254_v7 = vpop.f32.mrf.mxu0  ;;  %v2259_v8 = vpop.f32.mrf.mxu1 }
 0x374   : > { %v1245_v9 = vsel %vm1048_vm3, %v1139_v6, -inf  ;;  %v1488_v8 = vld [vmem:[%s2940_s17 + $0x4] sm:$0xf] }
 0x375   : > { %v1141_v10 = vpop.f32.mrf.mxu1  ;;  %1246 = vmax.xlane.f32.xlu1 %v1245_v9  ;;  %v1187_v11 = vpop.f32.mrf.mxu0  ;;  %v1541_v9 = vsel %vm1295_vm4, %v1488_v8, 0 }
 0x376   : > { %v1188_v12 = vadd.f32 %v2139_v63, %v1187_v11  ;;  %v1489_v10 = vld [vmem:[%s2940_s17 + $0x8] sm:$0xf] }
 0x377   : > { %v2260_v13 = vpop.f32.mrf.mxu1  ;;  %v2265_v14 = vpop.f32.mrf.mxu0 }
 0x378   : > { %v1248_v15 = vsel %vm1048_vm3, %v1188_v12, -inf  ;;  %v1587_v13 = vsel %vm1295_vm4, %v1489_v10, 0 }
 0x379   : > { %v1236_v16 = vpop.f32.mrf.mxu1  ;;  %1249 = vmax.xlane.f32.xlu0 %v1248_v15  ;;  %v1190_v18 = vpop.f32.mrf.mxu0  ;;  %v1490_v15 = vld [vmem:[%s2940_s17 + $0xc] sm:$0xf] }
 0x37a   : > { %v1237_v19 = vadd.f32 %v2139_v63, %v1236_v16 }
 0x37b   : > { %v2266_v20 = vpop.f32.mrf.mxu0  ;;  %v2271_v22 = vpop.f32.mrf.mxu1 }
 0x37c   : > { %v1251_v23 = vsel %vm1048_vm3, %v1237_v19, -inf  ;;  %v1633_v20 = vsel %vm1295_vm4, %v1490_v15, 0  ;;  %v2397_v15 = vld [vmem:[%s2645_s24 + $0x18] sm:$0xff]  }
 0x37d   : > { %v1239_v24 = vpop.f32.mrf.mxu1  ;;  %1252 = vmax.xlane.f32.xlu0 %v1251_v23 }
 0x37f   : > { %v2272_v25 = vpop.f32.mrf.mxu1 }
 0x386   : > { %1290 = vrot.lane.b32.xlu1 %v2712_v34, %s2466_s21 }
 0x3fa   : > { %v1244_v26 = vpop.xlane.xlu0 %1243 }
 0x3fb   : > { %v1254_v27 = vsub.f32 %v1090_v1, %v1244_v26 }
 0x3fd   : > { %v1258_v28 = vmul.f32 1.442695, %v1254_v27 }
 0x3fe   : > { %v1247_v29 = vpop.xlane.xlu1 %1246 }
 0x3ff   : > { %2401 = vpow2.f32 %v1258_v28  ;;  %v1255_v30 = vsub.f32 %v1139_v6, %v1247_v29  ;;  %v1487_v6 = vld [vmem:[%s2940_s17] sm:$0xf] }
 0x400   : > { %v1495_v7 = vsel %vm1295_vm4, %v1487_v6, 0 }
 0x401   : > { %v1260_v31 = vmul.f32 1.442695, %v1255_v30 }
 0x402   : > { %v1291_v32 = vpop.permute.xlu1 %1290  ;;  %v1250_v33 = vpop.xlane.xlu0 %1249 }
 0x403   : > { %2403 = vpow2.f32 %v1260_v31  ;;  %v1297_v35 = vsel %vm1295_vm4, %v1291_v32, 0  ;;  %v1256_v36 = vsub.f32 %v1188_v12, %v1250_v33 }
 0x404   : > { %2274 = vmatpush3.bf16.msra.mxu0 %v1297_v35 }
 0x405   : > { %v1262_v38 = vmul.f32 1.442695, %v1256_v36  ;;  %2285 = vmatprep.subr.bf16.mxu0 %v2463_v17 }
 0x406   : > { %v1253_v39 = vpop.xlane.xlu0 %1252 }
 0x407   : > { %2405 = vpow2.f32 %v1262_v38  ;;  %v1257_v34 = vsub.f32 %v1237_v19, %v1253_v39 }
 0x409   : > { %v1264_v40 = vmul.f32 1.442695, %v1257_v34 }
 0x40b   : > { %2407 = vpow2.f32 %v1264_v40 }
 0x40c   : > { %v2402_v41 = vpop.eup %2401 }
 0x40d   : > { %v1266_v42 = vsel %vm1048_vm3, %v2402_v41, 0.0 }
 0x40e   : > { %1267 = vadd.xlane.f32.xlu1 %v1266_v42 }
 0x410   : > { %v2404_v43 = vpop.eup %2403 }
 0x411   : > { %v1269_v44 = vsel %vm1048_vm3, %v2404_v43, 0.0 }
 0x412   : > { %1270 = vadd.xlane.f32.xlu0 %v1269_v44 }
 0x414   : > { %v2406_v45 = vpop.eup %2405 }
 0x415   : > { %v1272_v46 = vsel %vm1048_vm3, %v2406_v45, 0.0 }
 0x416   : > { %1273 = vadd.xlane.f32.xlu1 %v1272_v46 }
 0x418   : > { %v2408_v47 = vpop.eup %2407 }
 0x419   : > { %v1275_v49 = vsel %vm1048_vm3, %v2408_v47, 0.0 }
 0x41a   : > { %1276 = vadd.xlane.f32.xlu0 %v1275_v49 }
 0x427   : > { %1387 = vrot.lane.b32.xlu1 %v2720_v48, %s2466_s21 }
 0x42b   : > { %1435 = vrot.lane.b32.xlu1 %v2722_v51, %s2466_s21 }
 0x430   : > { %1339 = vrot.lane.b32.xlu0 %v2714_v37, %s2466_s21 }
 0x497   : > { %v1268_v50 = vpop.xlane.xlu1 %1267 }
 0x498   : > { %2409 = vrcp.f32 %v1268_v50 }
 0x49b   : > { %v1271_v52 = vpop.xlane.xlu0 %1270 }
 0x49c   : > { %2411 = vrcp.f32 %v1271_v52 }
 0x49f   : > { %v1274_v53 = vpop.xlane.xlu1 %1273 }
 0x4a0   : > { %2413 = vrcp.f32 %v1274_v53 }
 0x4a3   : > { %v1277_v54 = vpop.xlane.xlu0 %1276  ;;  %v1388_v56 = vpop.permute.xlu1 %1387 }
 0x4a4   : > { %2415 = vrcp.f32 %v1277_v54  ;;  %v1393_v51 = vsel %vm1295_vm4, %v1388_v56, 0 }
 0x4a5   : > { %v2410_v55 = vpop.eup %2409 }
 0x4a6   : > { %v1282_v57 = vmul.f32 %v2410_v55, %v2402_v41 }
 0x4a7   : > { %v1340_v58 = vpop.permute.xlu0 %1339  ;;  %v1436_v61 = vpop.permute.xlu1 %1435 }
 0x4a8   : > { %v1345_v48 = vsel %vm1295_vm4, %v1340_v58, 0  ;;  %v1286_v59 = vpack.c.bf16 %v1282_v57, %v1282_v57  ;;  %v1441_v0 = vsel %vm1295_vm4, %v1436_v61, 0  ;;  %v2152_v57 = vld [vmem:[%s2941_s6] ss:$0 sm:$0xff] }
 0x4a9   : > { %v2412_v60 = vpop.eup %2411  ;;  %2280 = vmatpush3.bf16.msra.mxu1 %v1345_v48 }
 0x4aa   : > { %2276 = vmatmul.mubr.msk.bf16.vlgmr.msra.gmra.mxu0 %vm1048_vm3, %v1286_v59  ;;  %2291 = vmatprep.subr.bf16.mxu1 %v2463_v17  ;;  %v1283_v37 = vmul.f32 %v2412_v60, %v2404_v43 }
 0x4ab   : > { %2286 = vmatpush3.bf16.msra.mxu0 %v1393_v51  ;;  %2287 = vmatprep.mubr.msk.bf16.mxu0 %vm2464_vm1, %v2463_v17 }
 0x4ac   : > { %v1287_v62 = vpack.c.bf16 %v1283_v37, %v1283_v37  ;;  %2297 = vmatprep.subr.bf16.mxu0 %v2463_v17 }
 0x4ad   : > { %v2414_v63 = vpop.eup %2413 }
 0x4ae   : > { %2282 = vmatmul.mubr.msk.bf16.vlgmr.msra.gmra.mxu1 %vm1048_vm3, %v1287_v62  ;;  %v1284_v1 = vmul.f32 %v2414_v63, %v2406_v45 }
 0x4af   : > { %2292 = vmatpush3.bf16.msra.mxu1 %v1441_v0  ;;  %2293 = vmatprep.mubr.msk.bf16.mxu1 %vm2464_vm1, %v2463_v17 }
 0x4b0   : > { %v1288_v2 = vpack.c.bf16 %v1284_v1, %v1284_v1  ;;  %2303 = vmatprep.subr.bf16.mxu1 %v2463_v17 }
 0x4b1   : > { %v2416_v3 = vpop.eup %2415 }
 0x4b2   : > { %2288 = vmatmul.mubr.msk.bf16.vlgmr.msra.gmra.mxu0 %vm1048_vm3, %v1288_v2  ;;  %v1285_v4 = vmul.f32 %v2416_v3, %v2408_v47 }
 0x4b3   : > { %2299 = vmatprep.mubr.msk.bf16.mxu0 %vm2464_vm1, %v2463_v17  ;;  %2298 = vmatpush3.bf16.msra.mxu0 %v1495_v7 }
 0x4b4   : > { %v1289_v5 = vpack.c.bf16 %v1285_v4, %v1285_v4  ;;  %2309 = vmatprep.subr.bf16.mxu0 %v2463_v17  ;;  %v2395_v4 = vld [vmem:[%s2631_s5 + $0x8] sm:$0xff]  }
 0x4b6   : > { %2294 = vmatmul.mubr.msk.bf16.vlgmr.msra.gmra.mxu1 %vm1048_vm3, %v1289_v5  ;;  %v2396_v5 = vld [vmem:[%s2631_s5] sm:$0xff]   ;;  %s2943_s5 = scalar_lea.vmem %s2896_s9, %s2588_s28 }
 0x4b7   : > { %2305 = vmatprep.mubr.msk.bf16.mxu1 %vm2464_vm1, %v2463_v17  ;;  %2304 = vmatpush3.bf16.msra.mxu1 %v1541_v9  ;;  %v2153_v9 = vld [vmem:[%s2942_s18] ss:$0 sm:$0xff] }
 0x4b8   : > { %2315 = vmatprep.subr.bf16.mxu1 %v2463_v17 }
 0x56a   : > { %v1333_v11 = vpop.f32.mrf.mxu0 }
 0x56b   : > { %v1483_v12 = vpack.c.bf16 %v1333_v11, %v1333_v11  ;;  %v2154_v11 = vld [vmem:[%s2943_s5] ss:$0 sm:$0xff] }
 0x56c   : > { %v2277_v14 = vpop.f32.mrf.mxu0 }
 0x56d   : > { %2300 = vmatmul.mubr.msk.bf16.vlgmr.msra.gmra.mxu0 %vm1048_vm3, %v1483_v12 }
 0x56e   : > { %v1336_v16 = vpop.f32.mrf.mxu0  ;;  %v1381_v18 = vpop.f32.mrf.mxu1  ;;  %2310 = vmatpush3.bf16.msra.mxu0 %v1587_v13  ;;  %2311 = vmatprep.mubr.msk.bf16.mxu0 %vm2464_vm1, %v2463_v17 }
 0x56f   : > { %v1484_v19 = vpack.c.bf16 %v1381_v18, %v1381_v18  ;;  %2321 = vmatprep.subr.bf16.mxu0 %v2463_v17  ;;  %v2398_v16 = vld [vmem:[%s2645_s24 + $0x10] sm:$0xff]   ;;  %v2399_v18 = vld [vmem:[%s2645_s24 + $0x8] sm:$0xff]  }
 0x570   : > { %v2278_v22 = vpop.f32.mrf.mxu0  ;;  %v2283_v23 = vpop.f32.mrf.mxu1 }
 0x571   : > { %2306 = vmatmul.mubr.msk.bf16.vlgmr.msra.gmra.mxu1 %vm1048_vm3, %v1484_v19  ;;  %v2400_v19 = vld [vmem:[%s2645_s24] sm:$0xff]  }
 0x572   : > { %v1384_v24 = vpop.f32.mrf.mxu1  ;;  %v1429_v25 = vpop.f32.mrf.mxu0  ;;  %2316 = vmatpush3.bf16.msra.mxu1 %v1633_v20  ;;  %2317 = vmatprep.mubr.msk.bf16.mxu1 %vm2464_vm1, %v2463_v17  ;;  %v2155_v20 = vld [vmem:[%s2944_s23] ss:$0 sm:$0xff] }
 0x573   : > { %v1485_v26 = vpack.c.bf16 %v1429_v25, %v1429_v25  ;;  %2329 = vmatprep.subr.bf16.mxu1 %v2463_v17 }
 0x574   : > { %v2284_v27 = vpop.f32.mrf.mxu1  ;;  %v2289_v28 = vpop.f32.mrf.mxu0 }
 0x575   : > { %2312 = vmatmul.mubr.msk.bf16.vlgmr.msra.gmra.mxu0 %vm1048_vm3, %v1485_v26 }
 0x576   : > { %v1432_v29 = vpop.f32.mrf.mxu0  ;;  %v1477_v30 = vpop.f32.mrf.mxu1  ;;  %2325 = vmatprep.mubr.msk.bf16.mxu0 %vm2464_vm1, %v2463_v17  ;;  %2322 = vmatpush3.bf16.msra.mxu0 %v2395_v4 }
 0x577   : > { %v1486_v31 = vpack.c.bf16 %v1477_v30, %v1477_v30  ;;  %2323 = vmatprep.subr.bf16.mxu0 %v2463_v17 }
 0x578   : > { %v2290_v32 = vpop.f32.mrf.mxu0  ;;  %v2295_v33 = vpop.f32.mrf.mxu1 }
 0x579   : > { %2318 = vmatmul.mubr.msk.bf16.vlgmr.msra.gmra.mxu1 %vm1048_vm3, %v1486_v31  ;;  %v2159_v32 = vld [vmem:[%s727_s1] ss:$0 sm:$0xff] }
 0x57a   : > { %v1480_v35 = vpop.f32.mrf.mxu1  ;;  %2337 = vmatprep.mubr.msk.bf16.mxu1 %vm2464_vm1, %v2463_v17  ;;  %2324 = vmatpush3.bf16.msra.mxu0 %v2396_v5 }
 0x57b   : > { %2330 = vmatpush3.bf16.msra.mxu1 %v2397_v15 }
 0x57c   : > { %v2296_v36 = vpop.f32.mrf.mxu1  ;;  %2331 = vmatprep.subr.bf16.mxu1 %v2463_v17 }
 0x57f   : > { %2332 = vmatpush3.bf16.msra.mxu1 %v2398_v16 }
 0x580   : > { %2333 = vmatprep.subr.bf16.mxu1 %v2463_v17 }
 0x583   : > { %2334 = vmatpush3.bf16.msra.mxu1 %v2399_v18 }
 0x584   : > { %2335 = vmatprep.subr.bf16.mxu1 %v2463_v17 }
 0x587   : > { %2336 = vmatpush3.bf16.msra.mxu1 %v2400_v19 }
 0x62d   : > { %v1531_v38 = vpop.f32.mrf.mxu0 }
 0x62e   : > { %v1675_v46 = vsel %vm834_vm2, %v1531_v38, 0.0 }
 0x62f   : > { %v2301_v39 = vpop.f32.mrf.mxu0 }
 0x631   : > { %v1534_v34 = vpop.f32.mrf.mxu0  ;;  %v1577_v40 = vpop.f32.mrf.mxu1 }
 0x632   : > { %v1676_v43 = vsel %vm834_vm2, %v1577_v40, 0.0 }
 0x633   : > { %v2302_v41 = vpop.f32.mrf.mxu0  ;;  %v2307_v42 = vpop.f32.mrf.mxu1  ;;  %v1677_v49 = vadd.f32 %v1676_v43, %v1675_v46 }
 0x635   : > { %v1580_v44 = vpop.f32.mrf.mxu1  ;;  %v1623_v45 = vpop.f32.mrf.mxu0 }
 0x636   : > { %v1678_v47 = vsel %vm834_vm2, %v1623_v45, 0.0 }
 0x637   : > { %v2308_v50 = vpop.f32.mrf.mxu1  ;;  %v2313_v52 = vpop.f32.mrf.mxu0  ;;  %v1679_v53 = vadd.f32 %v1678_v47, %v1677_v49 }
 0x638   : > { %v2165_v52 = vld [vmem:[%s730_s3] ss:$0 sm:$0xff] }
 0x639   : > { %v1626_v54 = vpop.f32.mrf.mxu0  ;;  %v1669_v55 = vpop.f32.mrf.mxu1 }
 0x63a   : > { %v1680_v56 = vsel %vm834_vm2, %v1669_v55, 0.0  ;;  %v2166_v54 = vld [vmem:[%s733_s2] ss:$0 sm:$0xff] }
 0x63b   : > { %v1681_v58 = vadd.f32 %v1680_v56, %v1679_v53  ;;  %v2314_v48 = vpop.f32.mrf.mxu0  ;;  %v2319_v59 = vpop.f32.mrf.mxu1 }
 0x63d   : > { %v1689_v60 = vadd.f32 %v2152_v57, %v1681_v58  ;;  %v1672_v51 = vpop.f32.mrf.mxu1 }
 0x63f   : > { %v2320_v37 = vpop.f32.mrf.mxu1  ;;  %v1690_v61 = vadd.f32 %v1689_v60, %v2684_v21 }
 0x641   : > { %v1693_v62 = vsel %vm834_vm2, %v1690_v61, 0.0 }
 0x642   : > { %1694 = vadd.xlane.f32.xlu0 %v1693_v62 }
 0x6cb   : > { %v1695_v63 = vpop.xlane.xlu0 %1694 }
 0x6cc   : > { %v1697_v0 = vmul.f32 0.03125, %v1695_v63 }
 0x6ce   : > { %v1698_v1 = vsub.f32 %v1690_v61, %v1697_v0 }
 0x6d0   : > { %v1699_v2 = vmul.f32 %v1698_v1, %v1698_v1 }
 0x6d2   : > { %v1700_v3 = vsel %vm834_vm2, %v1699_v2, 0.0 }
 0x6d3   : > { %1701 = vadd.xlane.f32.xlu1 %v1700_v3 }
 0x75c   : > { %v1702_v21 = vpop.xlane.xlu1 %1701 }
 0x75d   : > { %v1703_v6 = vmul.f32 0.03125, %v1702_v21 }
 0x75f   : > { %v1704_v7 = vadd.f32 1e-12, %v1703_v6 }
 0x761   : > { %2417 = vrsqrt.f32 %v1704_v7 }
 0x76e   : > { %v2418_v8 = vpop.eup %2417 }
 0x76f   : > { %v1706_v10 = vmul.f32 %v2418_v8, %v1698_v1 }
 0x771   : > { %v1713_v12 = vmul.f32 %v2153_v9, %v1706_v10 }
 0x773   : > { %v1720_v13 = vadd.f32 %v2154_v11, %v1713_v12 }
 0x775   : > { %v1721_v14 = vpack.c.bf16 %v1720_v13, %v1720_v13 }
 0x777   : > { %2326 = vmatmul.mubr.msk.bf16.vlgmr.msra.gmra.mxu0 %vm834_vm2, %v1721_v14 }
 0x837   : > { %v1782_v22 = vpop.f32.mrf.mxu0 }
 0x838   : > { %v1783_v23 = vadd.f32 %v2155_v20, %v1782_v22 }
 0x839   : > { %v2327_v24 = vpop.f32.mrf.mxu0 }
 0x83a   : > { %v1789_v25 = vmul.f32 0.70710677, %v1783_v23  ;;  %v1788_v29 = vmul.f32 0.5, %v1783_v23 }
 0x83b   : > { %v1785_v26 = vpop.f32.mrf.mxu0 }
 0x83c   : > { %2419 = verf.f32 %v1789_v25 }
 0x83d   : > { %v2328_v27 = vpop.f32.mrf.mxu0 }
 0x849   : > { %v2420_v28 = vpop.eup %2419 }
 0x84a   : > { %v1791_v30 = vadd.f32 1.0, %v2420_v28 }
 0x84c   : > { %v1792_v31 = vmul.f32 %v1791_v30, %v1788_v29 }
 0x84e   : > { %v1793_v17 = vpack.c.bf16 %v1792_v31, %v1792_v31 }
 0x850   : > { %2338 = vmatmul.mubr.msk.bf16.vlgmr.msra.gmra.mxu1 %vm1833_vm5, %v1793_v17 }
 0x910   : > { %v1871_v33 = vpop.f32.mrf.mxu1 }
 0x911   : > { %v1872_v35 = vadd.f32 %v2159_v32, %v1871_v33 }
 0x912   : > { %v2339_v36 = vpop.f32.mrf.mxu1 }
 0x913   : > { %v1877_v38 = vadd.f32 %v1872_v35, %v1720_v13 }
 0x914   : > { %v1874_v39 = vpop.f32.mrf.mxu1 }
 0x915   : > { %v1880_v34 = vsel %vm834_vm2, %v1877_v38, 0.0 }
 0x916   : > { %1881 = vadd.xlane.f32.xlu0 %v1880_v34  ;;  %v2340_v40 = vpop.f32.mrf.mxu1 }
 0x99f   : > { %v1882_v41 = vpop.xlane.xlu0 %1881 }
 0x9a0   : > { %v1883_v42 = vmul.f32 0.03125, %v1882_v41 }
 0x9a2   : > { %v1884_v43 = vsub.f32 %v1877_v38, %v1883_v42 }
 0x9a4   : > { %v1885_v44 = vmul.f32 %v1884_v43, %v1884_v43 }
 0x9a6   : > { %v1886_v45 = vsel %vm834_vm2, %v1885_v44, 0.0 }
 0x9a7   : > { %1887 = vadd.xlane.f32.xlu0 %v1886_v45 }
 0xa30   : > { %v1888_v46 = vpop.xlane.xlu0 %1887 }
 0xa31   : > { %v1889_v47 = vmul.f32 0.03125, %v1888_v46 }
 0xa33   : > { %v1890_v49 = vadd.f32 1e-12, %v1889_v47 }
 0xa35   : > { %2421 = vrsqrt.f32 %v1890_v49 }
 0xa42   : > { %v2422_v50 = vpop.eup %2421 }
 0xa43   : > { %v1892_v53 = vmul.f32 %v2422_v50, %v1884_v43 }
 0xa45   : > { %v1899_v55 = vmul.f32 %v2165_v52, %v1892_v53 }
 0xa47   : > { %v1906_v56 = vadd.f32 %v2166_v54, %v1899_v55 }
 0xa49   : > { %1907 = vst.msk [vmem:[%s2658_s10] sm:$0xff] %vm834_vm2, %v1906_v56 }
 0xa4a PF: > { %s2945_s17 = sld [smem:[#allocation5_spill]] }
 0xa4b   : > { %s2946_s21 = sld [smem:[#allocation3_spill]] }
 0xa4c   : > { %s2947_s22 = sld [smem:[#allocation4_spill]] }
 0xa4d   : > { %s2948_s23 = sld [smem:[#allocation6_spill]] }
 0xa4e   : > { %s2949_s24 = sld [smem:[#allocation7_spill]] }
 0xa50   : > { %s26_s25 = sadd.s32 1, %s2945_s17  }
 0xa51   : > { %p23_p8 = scmp.ge.s32.totalorder %s26_s25, 6  }
 0xa53   :  { %25 = sbr.rel (!%p23_p8) target bundleno = 10 (0xa), region = 157 }

</bundles_post_ra>
